<compile_context>
chip_gen: v5e
topology: v5e:2x2
jax: 0.10.0
libtpu: 0.0.40
codegen_flags: <defaults>
</compile_context>

<pallas_src>
import jax
import jax.numpy as jnp
from jax import lax
from jax.experimental import pallas as pl
from jax.experimental.pallas import tpu as pltpu

HIDDEN = 32
INPUT = 8
OUTPUT = 1
SEQ = 8
B_TILE = 8          # sequences packed into the sublane axis per kernel invocation


def lstm_kernel(x_ref, wih_ref, whh_ref, b_ref, wlin_ref, blin_ref, out_ref):
    """Batched single-layer LSTM + Linear head for one group of B_TILE sequences.

    x_ref:    (SEQ*B, INPUT)    rows ordered t-major: row = t*B + b
    wih_ref:  (INPUT, 4H)       W_ih^T, i/f/o columns pre-scaled by 0.5
    whh_ref:  (HIDDEN, 4H)      W_hh^T, i/f/o columns pre-scaled by 0.5
    b_ref:    (1, 4H)           b_ih + b_hh, i/f/o entries pre-scaled by 0.5
    wlin_ref: (HIDDEN, OUTPUT)  W_lin^T
    blin_ref: (1, OUTPUT)
    out_ref:  (SEQ*B, OUTPUT)   rows ordered t-major: row = t*B + b
    """
    H = HIDDEN
    B = B_TILE
    seq = x_ref.shape[0] // B

    # Input projection for the whole group in one MXU matmul, bias fused.
    xproj = (jnp.dot(x_ref[...], wih_ref[...],
                     preferred_element_type=jnp.float32) + b_ref[...])   # (seq*B, 4H)

    # Recurrent weights hoisted: loaded once, reused by every unrolled step.
    whh = whh_ref[...]                                                   # (H, 4H)

    # Lane-wise fixup constants for the single-tanh gate activation, hoisted
    # out of the recurrence. Gate order is PyTorch's [i, f, g, o]; i/f/o were
    # pre-scaled by 0.5 so sigmoid(z) = 0.5*tanh(z/2) + 0.5, while g keeps tanh.
    lane = lax.broadcasted_iota(jnp.int32, (1, 4 * H), 1)
    is_g = jnp.logical_and(lane >= 2 * H, lane < 3 * H)
    act_scale = jnp.where(is_g, jnp.float32(1.0), jnp.float32(0.5))
    act_shift = jnp.where(is_g, jnp.float32(0.0), jnp.float32(0.5))

    # Register-carried state; fully unrolled recurrence (static trip count).
    h = jnp.zeros((B, H), jnp.float32)
    c = jnp.zeros((B, H), jnp.float32)
    h_steps = []
    for t in range(seq):
        gates = xproj[t * B:(t + 1) * B, :] + jnp.dot(
            h, whh, preferred_element_type=jnp.float32)                  # (B, 4H)
        # One EUP launch over the full (B,128) gates vreg + one VPU mul-add fixup.
        act = jnp.tanh(gates) * act_scale + act_shift
        i_g = act[:, 0:H]
        f_g = act[:, H:2 * H]
        g_g = act[:, 2 * H:3 * H]
        o_g = act[:, 3 * H:4 * H]
        c = f_g * c + i_g * g_g
        h = o_g * jnp.tanh(c)
        h_steps.append(h)          # register-carried; off the serial chain

    # Output head hoisted out of the recurrence: one (seq*B,H)@(H,1) matmul and
    # a single store (no VMEM scratch round trip).
    h_all = jnp.concatenate(h_steps, axis=0)                             # (seq*B, H)
    out_ref[...] = (jnp.dot(h_all, wlin_ref[...],
                            preferred_element_type=jnp.float32)
                    + blin_ref[...])


def prepare_params(w_ih, w_hh, b_ih, b_hh, w_lin, b_lin):
    """One-time weight prep outside the hot path.

    Transposes, bias fusion and the 0.5 pre-scale of the i/f/o gate columns
    used by the in-kernel single-tanh activation (g columns stay unscaled).
    """
    H = HIDDEN
    gate_scale = jnp.concatenate([
        jnp.full((2 * H,), 0.5, jnp.float32),    # i, f  -> sigmoid via tanh(z/2)
        jnp.ones((H,), jnp.float32),             # g     -> tanh (unscaled)
        jnp.full((H,), 0.5, jnp.float32),        # o     -> sigmoid via tanh(z/2)
    ])
    wih_t = (jnp.transpose(w_ih) * gate_scale[None, :]).astype(jnp.float32)   # (INPUT, 4H)
    whh_t = (jnp.transpose(w_hh) * gate_scale[None, :]).astype(jnp.float32)   # (HIDDEN, 4H)
    b = ((b_ih + b_hh) * gate_scale).reshape(1, 4 * H).astype(jnp.float32)
    wlin_t = jnp.transpose(w_lin).astype(jnp.float32)                         # (HIDDEN, 1)
    blin = b_lin.reshape(1, OUTPUT).astype(jnp.float32)
    return wih_t, whh_t, b, wlin_t, blin


@jax.jit
def lstm_forward_batched(xs, wih_t, whh_t, b, wlin_t, blin):
    """xs: (NS, seq, INPUT) independent sequences, NS a multiple of B_TILE.

    Returns (NS, seq); each row equals the PyTorch module forward of that sequence.
    """
    NS, seq, _ = xs.shape
    B = B_TILE
    assert NS % B == 0
    NB = NS // B
    # t-major row packing per group: row = g*seq*B + t*B + b. Layout plumbing is
    # done by XLA outside the kernel so the kernel sees sublane-dense slabs.
    x_rows = (xs.astype(jnp.float32)
              .reshape(NB, B, seq, INPUT)
              .transpose(0, 2, 1, 3)
              .reshape(NB * seq * B, INPUT))

    out = pl.pallas_call(
        lstm_kernel,
        out_shape=jax.ShapeDtypeStruct((NB * seq * B, OUTPUT), jnp.float32),
        grid=(NB,),
        in_specs=[
            pl.BlockSpec((seq * B, INPUT), lambda g: (g, 0)),      # x rows of group g
            pl.BlockSpec((INPUT, 4 * HIDDEN), lambda g: (0, 0)),   # W_ih^T (resident)
            pl.BlockSpec((HIDDEN, 4 * HIDDEN), lambda g: (0, 0)),  # W_hh^T (resident)
            pl.BlockSpec((1, 4 * HIDDEN), lambda g: (0, 0)),       # fused bias
            pl.BlockSpec((HIDDEN, OUTPUT), lambda g: (0, 0)),      # W_lin^T
            pl.BlockSpec((1, OUTPUT), lambda g: (0, 0)),           # b_lin
        ],
        out_specs=pl.BlockSpec((seq * B, OUTPUT), lambda g: (g, 0)),
        compiler_params=pltpu.CompilerParams(
            dimension_semantics=("parallel",)),   # v7x: groups split across the 2 TCs
    )(x_rows, wih_t, whh_t, b, wlin_t, blin)

    return out.reshape(NB, seq, B).transpose(0, 2, 1).reshape(NS, seq)


def lstm_forward(x, wih_t, whh_t, b, wlin_t, blin):
    """PyTorch-module-equivalent forward for ONE sequence x: (seq, INPUT) -> (seq,).

    The single-sequence case rides the batched kernel with the idle sublanes
    filled by copies of the same sequence.
    """
    xs = jnp.broadcast_to(x[None, :, :], (B_TILE,) + x.shape)
    return lstm_forward_batched(xs, wih_t, whh_t, b, wlin_t, blin)[0]


def lstm_reference_single(x, w_ih, w_hh, b_ih, b_hh, w_lin, b_lin):
    """Pure-JAX reference mirroring torch.nn.LSTM + Linear for one sequence."""
    H = HIDDEN

    def step(carry, x_t):
        h, c = carry
        gates = w_ih @ x_t + b_ih + w_hh @ h + b_hh
        i_g = jax.nn.sigmoid(gates[0:H])
        f_g = jax.nn.sigmoid(gates[H:2 * H])
        g_g = jnp.tanh(gates[2 * H:3 * H])
        o_g = jax.nn.sigmoid(gates[3 * H:4 * H])
        c = f_g * c + i_g * g_g
        h = o_g * jnp.tanh(c)
        return (h, c), (w_lin @ h + b_lin)[0]

    init = (jnp.zeros((H,), jnp.float32), jnp.zeros((H,), jnp.float32))
    _, outs = lax.scan(step, init, x.astype(jnp.float32))
    return outs


if __name__ == "__main__":
    key = jax.random.PRNGKey(0)
    ks = jax.random.split(key, 7)
    bound = 1.0 / jnp.sqrt(jnp.float32(HIDDEN))

    # Deterministic synthetic parameters (PyTorch-style uniform init shapes).
    w_ih = jax.random.uniform(ks[0], (4 * HIDDEN, INPUT), jnp.float32, -bound, bound)
    w_hh = jax.random.uniform(ks[1], (4 * HIDDEN, HIDDEN), jnp.float32, -bound, bound)
    b_ih = jax.random.uniform(ks[2], (4 * HIDDEN,), jnp.float32, -bound, bound)
    b_hh = jax.random.uniform(ks[3], (4 * HIDDEN,), jnp.float32, -bound, bound)
    w_lin = jax.random.uniform(ks[4], (OUTPUT, HIDDEN), jnp.float32, -bound, bound)
    b_lin = jax.random.uniform(ks[5], (OUTPUT,), jnp.float32, -bound, bound)

    # 16 independent sequences -> grid=(2,) groups of 8 packed into sublanes.
    NS = 2 * B_TILE
    xs = jax.random.normal(ks[6], (NS, SEQ, INPUT), jnp.float32)

    # One-time param prep (transposes + fused bias + gate pre-scale).
    params = prepare_params(w_ih, w_hh, b_ih, b_hh, w_lin, b_lin)
    params = jax.tree_util.tree_map(jax.block_until_ready, params)

    out = lstm_forward_batched(xs, *params)
    out = jax.block_until_ready(out)
    assert out.shape == (NS, SEQ)

    ref = jax.vmap(lstm_reference_single,
                   in_axes=(0, None, None, None, None, None, None))(
        xs, w_ih, w_hh, b_ih, b_hh, w_lin, b_lin)
    assert jnp.allclose(out, ref, atol=2e-5, rtol=2e-5), (out, ref)

    # Single-sequence path matching the PyTorch module forward exactly.
    single = jax.block_until_ready(lstm_forward(xs[0], *params))
    assert single.shape == (SEQ,)
    assert jnp.allclose(single, ref[0], atol=2e-5, rtol=2e-5), (single, ref[0])

    print("KERNEL_OK")
</pallas_src>

<mosaic_0001>
module attributes {stable_mosaic.version = 11 : i64} {
  func.func @lstm_kernel(%arg0: i32, %arg1: memref<64x8xf32, #tpu.memory_space<vmem>>, %arg2: memref<8x128xf32, #tpu.memory_space<vmem>>, %arg3: memref<32x128xf32, #tpu.memory_space<vmem>>, %arg4: memref<1x128xf32, #tpu.memory_space<vmem>>, %arg5: memref<32x1xf32, #tpu.memory_space<vmem>>, %arg6: memref<1x1xf32, #tpu.memory_space<vmem>>, %arg7: memref<64x1xf32, #tpu.memory_space<vmem>>) attributes {dimension_semantics = [#tpu.dimension_semantics<parallel>], iteration_bounds = array<i64: 2>, scalar_prefetch = 0 : i64, scratch_operands = 0 : i64, tpu.core_type = #tpu.core_type<tc>, window_params = [{transform_indices = @transform_0, window_bounds = array<i64: 64, 8>}, {pipeline_mode = #tpu.pipeline_mode<synchronous>, transform_indices = @transform_1, window_bounds = array<i64: 8, 128>}, {pipeline_mode = #tpu.pipeline_mode<synchronous>, transform_indices = @transform_2, window_bounds = array<i64: 32, 128>}, {pipeline_mode = #tpu.pipeline_mode<synchronous>, transform_indices = @transform_3, window_bounds = array<i64: 1, 128>}, {pipeline_mode = #tpu.pipeline_mode<synchronous>, transform_indices = @transform_4, window_bounds = array<i64: 32, 1>}, {pipeline_mode = #tpu.pipeline_mode<synchronous>, transform_indices = @transform_5, window_bounds = array<i64: 1, 1>}, {transform_indices = @transform_6, window_bounds = array<i64: 64, 1>}]} {
    %c0 = arith.constant 0 : index
    %c0_0 = arith.constant 0 : index
    %0 = vector.load %arg1[%c0, %c0_0] : memref<64x8xf32, #tpu.memory_space<vmem>>, vector<64x8xf32>
    %c0_1 = arith.constant 0 : index
    %c0_2 = arith.constant 0 : index
    %1 = vector.load %arg2[%c0_1, %c0_2] : memref<8x128xf32, #tpu.memory_space<vmem>>, vector<8x128xf32>
    %cst = arith.constant dense<0.000000e+00> : vector<64x128xf32>
    %2 = tpu.matmul %0, %1, %cst {dimension_numbers = #tpu.dot_dimension_numbers<[1], [0], [0], [1], [0, 0, 1, 1], [], []>} : vector<64x8xf32>, vector<8x128xf32>, vector<64x128xf32> -> vector<64x128xf32>
    %c0_3 = arith.constant 0 : index
    %c0_4 = arith.constant 0 : index
    %3 = vector.load %arg4[%c0_3, %c0_4] : memref<1x128xf32, #tpu.memory_space<vmem>>, vector<1x128xf32>
    %4 = vector.broadcast %3 : vector<1x128xf32> to vector<64x128xf32>
    %5 = arith.addf %2, %4 : vector<64x128xf32>
    %c0_5 = arith.constant 0 : index
    %c0_6 = arith.constant 0 : index
    %6 = vector.load %arg3[%c0_5, %c0_6] : memref<32x128xf32, #tpu.memory_space<vmem>>, vector<32x128xf32>
    %7 = tpu.iota {dimensions = array<i32: 1>} : vector<1x128xi32>
    %c64_i32 = arith.constant 64 : i32
    %8 = vector.broadcast %c64_i32 : i32 to vector<1x128xi32>
    %9 = arith.cmpi sge, %7, %8 : vector<1x128xi32>
    %c96_i32 = arith.constant 96 : i32
    %10 = vector.broadcast %c96_i32 : i32 to vector<1x128xi32>
    %11 = arith.cmpi slt, %7, %10 : vector<1x128xi32>
    %12 = arith.andi %9, %11 : vector<1x128xi1>
    %cst_7 = arith.constant 1.000000e+00 : f32
    %cst_8 = arith.constant 5.000000e-01 : f32
    %13 = vector.broadcast %cst_7 : f32 to vector<1x128xf32>
    %14 = vector.broadcast %cst_8 : f32 to vector<1x128xf32>
    %15 = arith.select %12, %13, %14 : vector<1x128xi1>, vector<1x128xf32>
    %cst_9 = arith.constant 0.000000e+00 : f32
    %cst_10 = arith.constant 5.000000e-01 : f32
    %16 = vector.broadcast %cst_9 : f32 to vector<1x128xf32>
    %17 = vector.broadcast %cst_10 : f32 to vector<1x128xf32>
    %18 = arith.select %12, %16, %17 : vector<1x128xi1>, vector<1x128xf32>
    %cst_11 = arith.constant 0.000000e+00 : f32
    %19 = vector.broadcast %cst_11 : f32 to vector<8x32xf32>
    %cst_12 = arith.constant 0.000000e+00 : f32
    %20 = vector.broadcast %cst_12 : f32 to vector<8x32xf32>
    %21 = vector.extract_strided_slice %5 {offsets = [0, 0], sizes = [8, 128], strides = [1, 1]} : vector<64x128xf32> to vector<8x128xf32>
    %cst_13 = arith.constant dense<0.000000e+00> : vector<8x128xf32>
    %22 = tpu.matmul %19, %6, %cst_13 {dimension_numbers = #tpu.dot_dimension_numbers<[1], [0], [0], [1], [0, 0, 1, 1], [], []>} : vector<8x32xf32>, vector<32x128xf32>, vector<8x128xf32> -> vector<8x128xf32>
    %23 = arith.addf %21, %22 : vector<8x128xf32>
    %24 = math.tanh %23 : vector<8x128xf32>
    %25 = vector.broadcast %15 : vector<1x128xf32> to vector<8x128xf32>
    %26 = arith.mulf %24, %25 : vector<8x128xf32>
    %27 = vector.broadcast %18 : vector<1x128xf32> to vector<8x128xf32>
    %28 = arith.addf %26, %27 : vector<8x128xf32>
    %29 = vector.extract_strided_slice %28 {offsets = [0, 0], sizes = [8, 32], strides = [1, 1]} : vector<8x128xf32> to vector<8x32xf32>
    %30 = vector.extract_strided_slice %28 {offsets = [0, 32], sizes = [8, 32], strides = [1, 1]} : vector<8x128xf32> to vector<8x32xf32>
    %31 = vector.extract_strided_slice %28 {offsets = [0, 64], sizes = [8, 32], strides = [1, 1]} : vector<8x128xf32> to vector<8x32xf32>
    %32 = vector.extract_strided_slice %28 {offsets = [0, 96], sizes = [8, 32], strides = [1, 1]} : vector<8x128xf32> to vector<8x32xf32>
    %33 = arith.mulf %30, %20 : vector<8x32xf32>
    %34 = arith.mulf %29, %31 : vector<8x32xf32>
    %35 = arith.addf %33, %34 : vector<8x32xf32>
    %36 = math.tanh %35 : vector<8x32xf32>
    %37 = arith.mulf %32, %36 : vector<8x32xf32>
    %38 = vector.extract_strided_slice %5 {offsets = [8, 0], sizes = [8, 128], strides = [1, 1]} : vector<64x128xf32> to vector<8x128xf32>
    %cst_14 = arith.constant dense<0.000000e+00> : vector<8x128xf32>
    %39 = tpu.matmul %37, %6, %cst_14 {dimension_numbers = #tpu.dot_dimension_numbers<[1], [0], [0], [1], [0, 0, 1, 1], [], []>} : vector<8x32xf32>, vector<32x128xf32>, vector<8x128xf32> -> vector<8x128xf32>
    %40 = arith.addf %38, %39 : vector<8x128xf32>
    %41 = math.tanh %40 : vector<8x128xf32>
    %42 = vector.broadcast %15 : vector<1x128xf32> to vector<8x128xf32>
    %43 = arith.mulf %41, %42 : vector<8x128xf32>
    %44 = vector.broadcast %18 : vector<1x128xf32> to vector<8x128xf32>
    %45 = arith.addf %43, %44 : vector<8x128xf32>
    %46 = vector.extract_strided_slice %45 {offsets = [0, 0], sizes = [8, 32], strides = [1, 1]} : vector<8x128xf32> to vector<8x32xf32>
    %47 = vector.extract_strided_slice %45 {offsets = [0, 32], sizes = [8, 32], strides = [1, 1]} : vector<8x128xf32> to vector<8x32xf32>
    %48 = vector.extract_strided_slice %45 {offsets = [0, 64], sizes = [8, 32], strides = [1, 1]} : vector<8x128xf32> to vector<8x32xf32>
    %49 = vector.extract_strided_slice %45 {offsets = [0, 96], sizes = [8, 32], strides = [1, 1]} : vector<8x128xf32> to vector<8x32xf32>
    %50 = arith.mulf %47, %35 : vector<8x32xf32>
    %51 = arith.mulf %46, %48 : vector<8x32xf32>
    %52 = arith.addf %50, %51 : vector<8x32xf32>
    %53 = math.tanh %52 : vector<8x32xf32>
    %54 = arith.mulf %49, %53 : vector<8x32xf32>
    %55 = vector.extract_strided_slice %5 {offsets = [16, 0], sizes = [8, 128], strides = [1, 1]} : vector<64x128xf32> to vector<8x128xf32>
    %cst_15 = arith.constant dense<0.000000e+00> : vector<8x128xf32>
    %56 = tpu.matmul %54, %6, %cst_15 {dimension_numbers = #tpu.dot_dimension_numbers<[1], [0], [0], [1], [0, 0, 1, 1], [], []>} : vector<8x32xf32>, vector<32x128xf32>, vector<8x128xf32> -> vector<8x128xf32>
    %57 = arith.addf %55, %56 : vector<8x128xf32>
    %58 = math.tanh %57 : vector<8x128xf32>
    %59 = vector.broadcast %15 : vector<1x128xf32> to vector<8x128xf32>
    %60 = arith.mulf %58, %59 : vector<8x128xf32>
    %61 = vector.broadcast %18 : vector<1x128xf32> to vector<8x128xf32>
    %62 = arith.addf %60, %61 : vector<8x128xf32>
    %63 = vector.extract_strided_slice %62 {offsets = [0, 0], sizes = [8, 32], strides = [1, 1]} : vector<8x128xf32> to vector<8x32xf32>
    %64 = vector.extract_strided_slice %62 {offsets = [0, 32], sizes = [8, 32], strides = [1, 1]} : vector<8x128xf32> to vector<8x32xf32>
    %65 = vector.extract_strided_slice %62 {offsets = [0, 64], sizes = [8, 32], strides = [1, 1]} : vector<8x128xf32> to vector<8x32xf32>
    %66 = vector.extract_strided_slice %62 {offsets = [0, 96], sizes = [8, 32], strides = [1, 1]} : vector<8x128xf32> to vector<8x32xf32>
    %67 = arith.mulf %64, %52 : vector<8x32xf32>
    %68 = arith.mulf %63, %65 : vector<8x32xf32>
    %69 = arith.addf %67, %68 : vector<8x32xf32>
    %70 = math.tanh %69 : vector<8x32xf32>
    %71 = arith.mulf %66, %70 : vector<8x32xf32>
    %72 = vector.extract_strided_slice %5 {offsets = [24, 0], sizes = [8, 128], strides = [1, 1]} : vector<64x128xf32> to vector<8x128xf32>
    %cst_16 = arith.constant dense<0.000000e+00> : vector<8x128xf32>
    %73 = tpu.matmul %71, %6, %cst_16 {dimension_numbers = #tpu.dot_dimension_numbers<[1], [0], [0], [1], [0, 0, 1, 1], [], []>} : vector<8x32xf32>, vector<32x128xf32>, vector<8x128xf32> -> vector<8x128xf32>
    %74 = arith.addf %72, %73 : vector<8x128xf32>
    %75 = math.tanh %74 : vector<8x128xf32>
    %76 = vector.broadcast %15 : vector<1x128xf32> to vector<8x128xf32>
    %77 = arith.mulf %75, %76 : vector<8x128xf32>
    %78 = vector.broadcast %18 : vector<1x128xf32> to vector<8x128xf32>
    %79 = arith.addf %77, %78 : vector<8x128xf32>
    %80 = vector.extract_strided_slice %79 {offsets = [0, 0], sizes = [8, 32], strides = [1, 1]} : vector<8x128xf32> to vector<8x32xf32>
    %81 = vector.extract_strided_slice %79 {offsets = [0, 32], sizes = [8, 32], strides = [1, 1]} : vector<8x128xf32> to vector<8x32xf32>
    %82 = vector.extract_strided_slice %79 {offsets = [0, 64], sizes = [8, 32], strides = [1, 1]} : vector<8x128xf32> to vector<8x32xf32>
    %83 = vector.extract_strided_slice %79 {offsets = [0, 96], sizes = [8, 32], strides = [1, 1]} : vector<8x128xf32> to vector<8x32xf32>
    %84 = arith.mulf %81, %69 : vector<8x32xf32>
    %85 = arith.mulf %80, %82 : vector<8x32xf32>
    %86 = arith.addf %84, %85 : vector<8x32xf32>
    %87 = math.tanh %86 : vector<8x32xf32>
    %88 = arith.mulf %83, %87 : vector<8x32xf32>
    %89 = vector.extract_strided_slice %5 {offsets = [32, 0], sizes = [8, 128], strides = [1, 1]} : vector<64x128xf32> to vector<8x128xf32>
    %cst_17 = arith.constant dense<0.000000e+00> : vector<8x128xf32>
    %90 = tpu.matmul %88, %6, %cst_17 {dimension_numbers = #tpu.dot_dimension_numbers<[1], [0], [0], [1], [0, 0, 1, 1], [], []>} : vector<8x32xf32>, vector<32x128xf32>, vector<8x128xf32> -> vector<8x128xf32>
    %91 = arith.addf %89, %90 : vector<8x128xf32>
    %92 = math.tanh %91 : vector<8x128xf32>
    %93 = vector.broadcast %15 : vector<1x128xf32> to vector<8x128xf32>
    %94 = arith.mulf %92, %93 : vector<8x128xf32>
    %95 = vector.broadcast %18 : vector<1x128xf32> to vector<8x128xf32>
    %96 = arith.addf %94, %95 : vector<8x128xf32>
    %97 = vector.extract_strided_slice %96 {offsets = [0, 0], sizes = [8, 32], strides = [1, 1]} : vector<8x128xf32> to vector<8x32xf32>
    %98 = vector.extract_strided_slice %96 {offsets = [0, 32], sizes = [8, 32], strides = [1, 1]} : vector<8x128xf32> to vector<8x32xf32>
    %99 = vector.extract_strided_slice %96 {offsets = [0, 64], sizes = [8, 32], strides = [1, 1]} : vector<8x128xf32> to vector<8x32xf32>
    %100 = vector.extract_strided_slice %96 {offsets = [0, 96], sizes = [8, 32], strides = [1, 1]} : vector<8x128xf32> to vector<8x32xf32>
    %101 = arith.mulf %98, %86 : vector<8x32xf32>
    %102 = arith.mulf %97, %99 : vector<8x32xf32>
    %103 = arith.addf %101, %102 : vector<8x32xf32>
    %104 = math.tanh %103 : vector<8x32xf32>
    %105 = arith.mulf %100, %104 : vector<8x32xf32>
    %106 = vector.extract_strided_slice %5 {offsets = [40, 0], sizes = [8, 128], strides = [1, 1]} : vector<64x128xf32> to vector<8x128xf32>
    %cst_18 = arith.constant dense<0.000000e+00> : vector<8x128xf32>
    %107 = tpu.matmul %105, %6, %cst_18 {dimension_numbers = #tpu.dot_dimension_numbers<[1], [0], [0], [1], [0, 0, 1, 1], [], []>} : vector<8x32xf32>, vector<32x128xf32>, vector<8x128xf32> -> vector<8x128xf32>
    %108 = arith.addf %106, %107 : vector<8x128xf32>
    %109 = math.tanh %108 : vector<8x128xf32>
    %110 = vector.broadcast %15 : vector<1x128xf32> to vector<8x128xf32>
    %111 = arith.mulf %109, %110 : vector<8x128xf32>
    %112 = vector.broadcast %18 : vector<1x128xf32> to vector<8x128xf32>
    %113 = arith.addf %111, %112 : vector<8x128xf32>
    %114 = vector.extract_strided_slice %113 {offsets = [0, 0], sizes = [8, 32], strides = [1, 1]} : vector<8x128xf32> to vector<8x32xf32>
    %115 = vector.extract_strided_slice %113 {offsets = [0, 32], sizes = [8, 32], strides = [1, 1]} : vector<8x128xf32> to vector<8x32xf32>
    %116 = vector.extract_strided_slice %113 {offsets = [0, 64], sizes = [8, 32], strides = [1, 1]} : vector<8x128xf32> to vector<8x32xf32>
    %117 = vector.extract_strided_slice %113 {offsets = [0, 96], sizes = [8, 32], strides = [1, 1]} : vector<8x128xf32> to vector<8x32xf32>
    %118 = arith.mulf %115, %103 : vector<8x32xf32>
    %119 = arith.mulf %114, %116 : vector<8x32xf32>
    %120 = arith.addf %118, %119 : vector<8x32xf32>
    %121 = math.tanh %120 : vector<8x32xf32>
    %122 = arith.mulf %117, %121 : vector<8x32xf32>
    %123 = vector.extract_strided_slice %5 {offsets = [48, 0], sizes = [8, 128], strides = [1, 1]} : vector<64x128xf32> to vector<8x128xf32>
    %cst_19 = arith.constant dense<0.000000e+00> : vector<8x128xf32>
    %124 = tpu.matmul %122, %6, %cst_19 {dimension_numbers = #tpu.dot_dimension_numbers<[1], [0], [0], [1], [0, 0, 1, 1], [], []>} : vector<8x32xf32>, vector<32x128xf32>, vector<8x128xf32> -> vector<8x128xf32>
    %125 = arith.addf %123, %124 : vector<8x128xf32>
    %126 = math.tanh %125 : vector<8x128xf32>
    %127 = vector.broadcast %15 : vector<1x128xf32> to vector<8x128xf32>
    %128 = arith.mulf %126, %127 : vector<8x128xf32>
    %129 = vector.broadcast %18 : vector<1x128xf32> to vector<8x128xf32>
    %130 = arith.addf %128, %129 : vector<8x128xf32>
    %131 = vector.extract_strided_slice %130 {offsets = [0, 0], sizes = [8, 32], strides = [1, 1]} : vector<8x128xf32> to vector<8x32xf32>
    %132 = vector.extract_strided_slice %130 {offsets = [0, 32], sizes = [8, 32], strides = [1, 1]} : vector<8x128xf32> to vector<8x32xf32>
    %133 = vector.extract_strided_slice %130 {offsets = [0, 64], sizes = [8, 32], strides = [1, 1]} : vector<8x128xf32> to vector<8x32xf32>
    %134 = vector.extract_strided_slice %130 {offsets = [0, 96], sizes = [8, 32], strides = [1, 1]} : vector<8x128xf32> to vector<8x32xf32>
    %135 = arith.mulf %132, %120 : vector<8x32xf32>
    %136 = arith.mulf %131, %133 : vector<8x32xf32>
    %137 = arith.addf %135, %136 : vector<8x32xf32>
    %138 = math.tanh %137 : vector<8x32xf32>
    %139 = arith.mulf %134, %138 : vector<8x32xf32>
    %140 = vector.extract_strided_slice %5 {offsets = [56, 0], sizes = [8, 128], strides = [1, 1]} : vector<64x128xf32> to vector<8x128xf32>
    %cst_20 = arith.constant dense<0.000000e+00> : vector<8x128xf32>
    %141 = tpu.matmul %139, %6, %cst_20 {dimension_numbers = #tpu.dot_dimension_numbers<[1], [0], [0], [1], [0, 0, 1, 1], [], []>} : vector<8x32xf32>, vector<32x128xf32>, vector<8x128xf32> -> vector<8x128xf32>
    %142 = arith.addf %140, %141 : vector<8x128xf32>
    %143 = math.tanh %142 : vector<8x128xf32>
    %144 = vector.broadcast %15 : vector<1x128xf32> to vector<8x128xf32>
    %145 = arith.mulf %143, %144 : vector<8x128xf32>
    %146 = vector.broadcast %18 : vector<1x128xf32> to vector<8x128xf32>
    %147 = arith.addf %145, %146 : vector<8x128xf32>
    %148 = vector.extract_strided_slice %147 {offsets = [0, 0], sizes = [8, 32], strides = [1, 1]} : vector<8x128xf32> to vector<8x32xf32>
    %149 = vector.extract_strided_slice %147 {offsets = [0, 32], sizes = [8, 32], strides = [1, 1]} : vector<8x128xf32> to vector<8x32xf32>
    %150 = vector.extract_strided_slice %147 {offsets = [0, 64], sizes = [8, 32], strides = [1, 1]} : vector<8x128xf32> to vector<8x32xf32>
    %151 = vector.extract_strided_slice %147 {offsets = [0, 96], sizes = [8, 32], strides = [1, 1]} : vector<8x128xf32> to vector<8x32xf32>
    %152 = arith.mulf %149, %137 : vector<8x32xf32>
    %153 = arith.mulf %148, %150 : vector<8x32xf32>
    %154 = arith.addf %152, %153 : vector<8x32xf32>
    %155 = math.tanh %154 : vector<8x32xf32>
    %156 = arith.mulf %151, %155 : vector<8x32xf32>
    %157 = tpu.concatenate %37, %54, %71, %88, %105, %122, %139, %156 in 0 : vector<8x32xf32>, vector<8x32xf32>, vector<8x32xf32>, vector<8x32xf32>, vector<8x32xf32>, vector<8x32xf32>, vector<8x32xf32>, vector<8x32xf32> -> vector<64x32xf32>
    %c0_21 = arith.constant 0 : index
    %c0_22 = arith.constant 0 : index
    %158 = vector.load %arg5[%c0_21, %c0_22] : memref<32x1xf32, #tpu.memory_space<vmem>>, vector<32x1xf32>
    %cst_23 = arith.constant dense<0.000000e+00> : vector<64x1xf32>
    %159 = tpu.matmul %157, %158, %cst_23 {dimension_numbers = #tpu.dot_dimension_numbers<[1], [0], [0], [1], [0, 0, 1, 1], [], []>} : vector<64x32xf32>, vector<32x1xf32>, vector<64x1xf32> -> vector<64x1xf32>
    %c0_24 = arith.constant 0 : index
    %c0_25 = arith.constant 0 : index
    %160 = vector.load %arg6[%c0_24, %c0_25] : memref<1x1xf32, #tpu.memory_space<vmem>>, vector<1x1xf32>
    %161 = vector.broadcast %160 : vector<1x1xf32> to vector<64x1xf32>
    %162 = arith.addf %159, %161 : vector<64x1xf32>
    %c0_26 = arith.constant 0 : index
    %c0_27 = arith.constant 0 : index
    %163 = vector.load %arg7[%c0_26, %c0_27] : memref<64x1xf32, #tpu.memory_space<vmem>>, vector<64x1xf32>
    tpu.vector_store %arg7[%c0_26, %c0_27], %162 {strides = array<i32>} : memref<64x1xf32, #tpu.memory_space<vmem>>, vector<64x1xf32>,
    return
  }
  func.func @transform_0(%arg0: i32) -> (i32, i32) {
    %c0_i32 = arith.constant 0 : i32
    %c0_i32_0 = arith.constant 0 : i32
    return %arg0, %c0_i32 : i32, i32
  }
  func.func @transform_1(%arg0: i32) -> (i32, i32) {
    %c0_i32 = arith.constant 0 : i32
    %c0_i32_0 = arith.constant 0 : i32
    %c0_i32_1 = arith.constant 0 : i32
    return %c0_i32, %c0_i32_0 : i32, i32
  }
  func.func @transform_2(%arg0: i32) -> (i32, i32) {
    %c0_i32 = arith.constant 0 : i32
    %c0_i32_0 = arith.constant 0 : i32
    %c0_i32_1 = arith.constant 0 : i32
    return %c0_i32, %c0_i32_0 : i32, i32
  }
  func.func @transform_3(%arg0: i32) -> (i32, i32) {
    %c0_i32 = arith.constant 0 : i32
    %c0_i32_0 = arith.constant 0 : i32
    %c0_i32_1 = arith.constant 0 : i32
    return %c0_i32, %c0_i32_0 : i32, i32
  }
  func.func @transform_4(%arg0: i32) -> (i32, i32) {
    %c0_i32 = arith.constant 0 : i32
    %c0_i32_0 = arith.constant 0 : i32
    %c0_i32_1 = arith.constant 0 : i32
    return %c0_i32, %c0_i32_0 : i32, i32
  }
  func.func @transform_5(%arg0: i32) -> (i32, i32) {
    %c0_i32 = arith.constant 0 : i32
    %c0_i32_0 = arith.constant 0 : i32
    %c0_i32_1 = arith.constant 0 : i32
    return %c0_i32, %c0_i32_0 : i32, i32
  }
  func.func @transform_6(%arg0: i32) -> (i32, i32) {
    %c0_i32 = arith.constant 0 : i32
    %c0_i32_0 = arith.constant 0 : i32
    return %arg0, %c0_i32 : i32, i32
  }
}

</mosaic_0001>

<bundles_post_ra>
// kernel: lstm_forward_batched.1
= control target key start
LH: loop header
LB: loop body
LE: loop exit
PB: predicated region body
PF: predicated region fallthrough
CT: control target
= control target key end

     0   :  { %s968_s23 = smov 0   ;;  %s1204_s0 = inlined_call_operand.vmem [shape: f32[128,8], index: 0, kind: input, shape index: {}]   ;;  %s1205_s1 = inlined_call_operand.vmem [shape: f32[8,128], index: 1, kind: input, shape index: {}]   ;;  %s1206_s2 = inlined_call_operand.vmem [shape: f32[32,128], index: 2, kind: input, shape index: {}]   ;;  %s1207_s3 = inlined_call_operand.vmem [shape: f32[1,128], index: 3, kind: input, shape index: {}]   ;;  %s1208_s4 = inlined_call_operand.vmem [shape: f32[32,1], index: 4, kind: input, shape index: {}]   ;;  %s1209_s5 = inlined_call_operand.<no memory space> [shape: f32[1,1], index: 5, kind: input, shape index: {}]   ;;  %s1210_s6 = inlined_call_operand.vmem [shape: f32[128,1], index: 6, kind: output, shape index: {}]  }
   0x1   :  { %v11_v0 = vstv %s1209_s5 }
   0x2   :  { %12 = vst [vmem:[#allocation2] sm:$0x1] %v11_v0 }
   0x3 LB: > { %s833_s24 = sadd.s32 4294967295, %s924_s23   ;;  %p837_p0 = scmp.ge.s32.totalorder %s924_s23, 1  ;;  %s924_s23 = sphi %s968_s23, %s18_s23  }
   0x4   : > { %p215_p1 = scmp.lt.s32.totalorder %s924_s23, 3 }
   0x6   : > { %p216_p2 = pnand %p837_p0, %p215_p1 }
   0x7   : > { %s838_s5 = sshll.u32 (!%p216_p2), %s833_s24, 3  ;;  %s928_s17 = smov (!%p216_p2), 64  }
   0x8   : > { %219 = sbr.rel (%p216_p2) target bundleno = 4856 (0x12f8), region = 44  ;;  %p246_p3 = scmp.lt.s32.totalorder (!%p216_p2), %s838_s5, 15 }
   0x9   : > { %s929_s18 = smov (!%p216_p2), 32  }
   0xd   : > { %v265_v1 = vld [vmem:[%s1205_s1] sm:$0xff]  ;;  %v982_v2 = vld [vmem:[%s1206_s2 + $0x18] sm:$0xff]  ;;  %v987_v3 = vld [vmem:[%s1206_s2 + $0x10] sm:$0xff]  ;;  %s1212_s5 = smov (!%p246_p3, %s838_s5), 15  ;;  %vm270_vm0 = vcmask 64512   ;;  %v926_v8 = vmov 0.0   ;;  %v340_v10 = vlaneseq }
   0xe   : > { %867 = vmatpush.msra.mxu2 %v265_v1  ;;  %310 = vmatpush.msra.mxu0 %v265_v1  ;;  %v996_v4 = vld [vmem:[%s1206_s2 + $0x8] sm:$0xff]  ;;  %s839_s9 = sshll.u32 %s1212_s5, 3  ;;  %v1014_v5 = vld [vmem:[%s1206_s2] sm:$0xff]  ;;  %v927_v17 = vmov 0.5   ;;  %vm347_vm4 = vcmask 261120   ;;  %vm768_vm5 = vcmask 7168  }
   0xf   : > { %455 = vmatpush.msra.mxu3 %v982_v2  ;;  %501 = vmatpush.msra.mxu1 %v982_v2  ;;  %s1008_s12 = scalar_lea.vmem %s1204_s0, %s839_s9  ;;  %v1046_v12 = vld [vmem:[%s1207_s3] ss:$0 sm:$0xff]  ;;  %v341_v14 = vand.u32 127, %v340_v10  ;;  %s1139_s30 = scalar_lea.vmem %s1210_s6, %s839_s9 }
  0x10   : > { %363 = vmatpush.msrb.mxu2 %v982_v2  ;;  %v264_v6 = vld [vmem:[%s1008_s12 + $0x38] sm:$0xff]  ;;  %v257_v7 = vld [vmem:[%s1008_s12] sm:$0xff]  ;;  %v258_v31 = vld [vmem:[%s1008_s12 + $0x8] sm:$0xff] }
  0x11   : > { %456 = vmatpush.msra.mxu3 %v987_v3  ;;  %502 = vmatpush.msra.mxu1 %v987_v3  ;;  %vm342_vm1 = vcmp.ge.s32.totalorder %v341_v14, 64  ;;  %vm343_vm2 = vcmp.lt.s32.totalorder %v341_v14, 96  ;;  %v259_v48 = vld [vmem:[%s1008_s12 + $0x10] sm:$0xff]  ;;  %v260_v63 = vld [vmem:[%s1008_s12 + $0x18] sm:$0xff] }
  0x12   : > { %364 = vmatpush.msrb.mxu2 %v987_v3  ;;  %842 = vmatmul.msk.f32.vlgmr.msra.gmra.mxu0 %vm270_vm0, %v257_v7  ;;  %vm344_vm3 = vmand %vm342_vm1, %vm343_vm2 }
  0x13   : > { %457 = vmatpush.msra.mxu3 %v996_v4  ;;  %503 = vmatpush.msra.mxu1 %v996_v4  ;;  %v1049_v18 = vsel %vm344_vm3, 1.0, %v927_v17  ;;  %v1051_v20 = vsel %vm344_vm3, 0.0, %v927_v17 }
  0x14   : > { %365 = vmatpush.msrb.mxu2 %v996_v4 }
  0x15   : > { %849 = vmatmul.msk.f32.vlgmr.msra.gmra.mxu2 %vm270_vm0, %v264_v6  ;;  %458 = vmatpush.msra.mxu3 %v1014_v5 }
  0x16   : > { %366 = vmatpush.msrb.mxu2 %v1014_v5  ;;  %504 = vmatpush.msra.mxu1 %v1014_v5 }
  0x17   : > { %593 = vmatpush.msrb.mxu3 %v982_v2 }
  0x18   : > { %409 = vmatpush.msra.mxu2 %v982_v2  ;;  %639 = vmatpush.msrb.mxu1 %v982_v2 }
  0x19   : > { %594 = vmatpush.msrb.mxu3 %v987_v3 }
  0x1a   : > { %410 = vmatpush.msra.mxu2 %v987_v3  ;;  %640 = vmatpush.msrb.mxu1 %v987_v3 }
  0x1b   : > { %595 = vmatpush.msrb.mxu3 %v996_v4  ;;  %843 = vmatmul.msk.f32.gmra.mxu0 %vm270_vm0, %v258_v31 }
  0x1c   : > { %411 = vmatpush.msra.mxu2 %v996_v4  ;;  %641 = vmatpush.msrb.mxu1 %v996_v4 }
  0x1d   : > { %367 = vmatmul.f32.vlgmr.msrb.gmra.mxu2 %v926_v8  ;;  %596 = vmatpush.msrb.mxu3 %v1014_v5 }
  0x1e   : > { %412 = vmatpush.msra.mxu2 %v1014_v5  ;;  %642 = vmatpush.msrb.mxu1 %v1014_v5 }
  0x20   : > { %547 = vmatpush.msrb.mxu2 %v982_v2 }
  0x22   : > { %548 = vmatpush.msrb.mxu2 %v987_v3 }
  0x23   : > { %844 = vmatmul.msk.f32.gmra.mxu0 %vm270_vm0, %v259_v48 }
  0x24   : > { %549 = vmatpush.msrb.mxu2 %v996_v4 }
  0x26   : > { %550 = vmatpush.msrb.mxu2 %v1014_v5 }
  0x2b   : > { %845 = vmatmul.msk.f32.gmra.mxu0 %vm270_vm0, %v260_v63  ;;  %v263_v63 = vld [vmem:[%s1008_s12 + $0x30] sm:$0xff] }
  0x8f   : > { %v312_v11 = vpop.f32.mrf.mxu0 }
  0x90   : > { %v313_v13 = vadd.f32 %v1046_v12, %v312_v11 }
  0x98   : > { %v1041_v9 = vpop.f32.mrf.mxu2  ;;  %v315_v33 = vpop.f32.mrf.mxu0 }
  0x99   : > { %v316_v34 = vadd.f32 %v1046_v12, %v315_v33 }
  0xa0   : > { %v368_v15 = vpop.f32.mrf.mxu2  ;;  %v318_v50 = vpop.f32.mrf.mxu0 }
  0xa1   : > { %v371_v16 = vadd.f32 %v368_v15, %v313_v13  ;;  %v319_v51 = vadd.f32 %v1046_v12, %v318_v50 }
  0xa3   : > { %886 = vtanh.f32 %v371_v16 }
  0xa9   : > { %v887_v19 = vpop.eup %886 }
  0xaa   : > { %v373_v21 = vmul.f32 %v887_v19, %v1049_v18 }
  0xac   : > { %v374_v22 = vadd.f32 %v373_v21, %v1051_v20 }
  0xae   : > { %377 = vrot.lane.b32.xlu0 %v374_v22, %s928_s17  ;;  %v375_v25 = vmul.f32 0.0, %v374_v22 }
 0x120   : > { %v378_v23 = vpop.permute.xlu0 %377 }
 0x121   : > { %v380_v24 = vmul.f32 %v378_v23, %v374_v22 }
 0x123   : > { %382 = vrot.lane.b32.xlu0 %v380_v24, %s929_s18 }
 0x195   : > { %v383_v26 = vpop.permute.xlu0 %382 }
 0x196   : > { %v385_v27 = vadd.f32 %v383_v26, %v375_v25 }
 0x198   : > { %888 = vtanh.f32 %v385_v27 }
 0x19e   : > { %v889_v28 = vpop.eup %888 }
 0x19f   : > { %388 = vrot.lane.b32.xlu1 %v889_v28, %s928_s17 }
 0x211   : > { %v389_v29 = vpop.permute.xlu1 %388 }
 0x212   : > { %v391_v30 = vmul.f32 %v389_v29, %v374_v22  ;;  %v261_v22 = vld [vmem:[%s1008_s12 + $0x20] sm:$0xff] }
 0x213   : > { %846 = vmatmul.msk.f32.gmra.mxu0 %vm270_vm0, %v261_v22 }
 0x214   : > { %393 = vrot.lane.b32.xlu1 %v391_v30, %s929_s18 }
 0x286   : > { %v1061_v32 = vpop.permute.xlu1 %393 }
 0x287   : > { %850 = vmatmul.msk.f32.vlgmr.msra.gmra.mxu2 %vm347_vm4, %v1061_v32 }
 0x288   : > { %685 = vmatpush.msra.mxu2 %v982_v2 }
 0x28a   : > { %686 = vmatpush.msra.mxu2 %v987_v3  ;;  %v321_v3 = vpop.f32.mrf.mxu0 }
 0x28c   : > { %687 = vmatpush.msra.mxu2 %v996_v4  ;;  %v322_v4 = vadd.f32 %v1046_v12, %v321_v3 }
 0x28e   : > { %688 = vmatpush.msra.mxu2 %v1014_v5 }
 0x292   : > { %v324_v24 = vpop.f32.mrf.mxu0 }
 0x293   : > { %v325_v25 = vadd.f32 %v1046_v12, %v324_v24 }
 0x30a   : > { %v414_v35 = vpop.f32.mrf.mxu2 }
 0x30b   : > { %v417_v36 = vadd.f32 %v414_v35, %v316_v34 }
 0x30d   : > { %890 = vtanh.f32 %v417_v36 }
 0x313   : > { %v891_v37 = vpop.eup %890 }
 0x314   : > { %v419_v38 = vmul.f32 %v891_v37, %v1049_v18 }
 0x316   : > { %v420_v39 = vadd.f32 %v419_v38, %v1051_v20 }
 0x318   : > { %423 = vrot.lane.b32.xlu2 %v420_v39, %s928_s17  ;;  %v421_v42 = vmul.f32 %v420_v39, %v385_v27 }
 0x372   : > { %v424_v40 = vpop.permute.xlu2 %423 }
 0x373   : > { %v426_v41 = vmul.f32 %v424_v40, %v420_v39  ;;  %v717_v40 = vld [vmem:[%s1208_s4 + $0x18] sm:$0xff] }
 0x375   : > { %428 = vrot.lane.b32.xlu2 %v426_v41, %s929_s18  ;;  %v716_v41 = vld [vmem:[%s1208_s4 + $0x10] sm:$0xff] }
 0x3cf   : > { %v429_v43 = vpop.permute.xlu2 %428 }
 0x3d0   : > { %v431_v44 = vadd.f32 %v429_v43, %v421_v42  ;;  %v262_v42 = vld [vmem:[%s1008_s12 + $0x28] sm:$0xff] }
 0x3d1   : > { %847 = vmatmul.msk.f32.gmra.mxu0 %vm270_vm0, %v262_v42  ;;  %v715_v43 = vld [vmem:[%s1208_s4 + $0x8] sm:$0xff] }
 0x3d2   : > { %892 = vtanh.f32 %v431_v44 }
 0x3d8   : > { %v893_v45 = vpop.eup %892 }
 0x3d9   : > { %434 = vrot.lane.b32.xlu0 %v893_v45, %s928_s17  ;;  %848 = vmatmul.msk.f32.gmra.mxu0 %vm270_vm0, %v263_v63 }
 0x44b   : > { %v435_v46 = vpop.permute.xlu0 %434 }
 0x44c   : > { %v437_v47 = vmul.f32 %v435_v46, %v420_v39 }
 0x44e   : > { %439 = vrot.lane.b32.xlu1 %v437_v47, %s929_s18  ;;  %v327_v46 = vpop.f32.mrf.mxu0 }
 0x44f   : > { %v328_v47 = vadd.f32 %v1046_v12, %v327_v46 }
 0x4c0   : > { %v1078_v49 = vpop.permute.xlu1 %439 }
 0x4c1   : > { %851 = vmatmul.msk.f32.vlgmr.msra.gmra.mxu3 %vm347_vm4, %v1078_v49 }
 0x4c2   : > { %868 = vmatpush.msra.mxu3 %v717_v40 }
 0x4c4   : > { %869 = vmatpush.msra.mxu3 %v716_v41 }
 0x4c6   : > { %870 = vmatpush.msra.mxu3 %v715_v43 }
 0x544   : > { %v460_v52 = vpop.f32.mrf.mxu3 }
 0x545   : > { %v463_v53 = vadd.f32 %v460_v52, %v319_v51  ;;  %v1132_v51 = vld [vmem:[#allocation2] ss:$0 sm:$0xff] }
 0x547   : > { %894 = vtanh.f32 %v463_v53 }
 0x54d   : > { %v895_v54 = vpop.eup %894 }
 0x54e   : > { %v465_v55 = vmul.f32 %v895_v54, %v1049_v18 }
 0x550   : > { %v466_v56 = vadd.f32 %v465_v55, %v1051_v20 }
 0x552   : > { %469 = vrot.lane.b32.xlu2 %v466_v56, %s928_s17  ;;  %v467_v59 = vmul.f32 %v466_v56, %v431_v44  ;;  %v714_v44 = vld [vmem:[%s1208_s4] sm:$0xff] }
 0x553   : > { %871 = vmatpush.msra.mxu3 %v714_v44 }
 0x5ac   : > { %v470_v57 = vpop.permute.xlu2 %469 }
 0x5ad   : > { %v472_v58 = vmul.f32 %v470_v57, %v466_v56 }
 0x5af   : > { %474 = vrot.lane.b32.xlu0 %v472_v58, %s929_s18 }
 0x621   : > { %v475_v60 = vpop.permute.xlu0 %474 }
 0x622   : > { %v477_v61 = vadd.f32 %v475_v60, %v467_v59 }
 0x624   : > { %896 = vtanh.f32 %v477_v61 }
 0x62a   : > { %v897_v62 = vpop.eup %896 }
 0x62b   : > { %480 = vrot.lane.b32.xlu1 %v897_v62, %s928_s17 }
 0x69d   : > { %v481_v0 = vpop.permute.xlu1 %480 }
 0x69e   : > { %v483_v1 = vmul.f32 %v481_v0, %v466_v56 }
 0x6a0   : > { %485 = vrot.lane.b32.xlu2 %v483_v1, %s929_s18 }
 0x6fa   : > { %v1091_v2 = vpop.permute.xlu2 %485 }
 0x6fb   : > { %852 = vmatmul.msk.f32.vlgmr.msra.gmra.mxu1 %vm347_vm4, %v1091_v2 }
 0x6fc   : > { %739 = vmatpush.msra.mxu1 %v717_v40 }
 0x6fe   : > { %740 = vmatpush.msra.mxu1 %v716_v41 }
 0x700   : > { %741 = vmatpush.msra.mxu1 %v715_v43 }
 0x702   : > { %742 = vmatpush.msra.mxu1 %v714_v44 }
 0x778   : > { %v506_v5 = vpop.f32.mrf.mxu1 }
 0x779   : > { %v509_v6 = vadd.f32 %v506_v5, %v322_v4  ;;  %v330_v4 = vpop.f32.mrf.mxu0 }
 0x77a   : > { %v331_v5 = vadd.f32 %v1046_v12, %v330_v4 }
 0x77b   : > { %898 = vtanh.f32 %v509_v6 }
 0x781   : > { %v899_v7 = vpop.eup %898 }
 0x782   : > { %v511_v8 = vmul.f32 %v899_v7, %v1049_v18 }
 0x784   : > { %v512_v10 = vadd.f32 %v511_v8, %v1051_v20 }
 0x786   : > { %515 = vrot.lane.b32.xlu0 %v512_v10, %s928_s17  ;;  %v513_v14 = vmul.f32 %v512_v10, %v477_v61 }
 0x7f8   : > { %v516_v11 = vpop.permute.xlu0 %515 }
 0x7f9   : > { %v518_v13 = vmul.f32 %v516_v11, %v512_v10 }
 0x7fb   : > { %520 = vrot.lane.b32.xlu1 %v518_v13, %s929_s18 }
 0x86d   : > { %v521_v15 = vpop.permute.xlu1 %520 }
 0x86e   : > { %v523_v16 = vadd.f32 %v521_v15, %v513_v14 }
 0x870   : > { %900 = vtanh.f32 %v523_v16 }
 0x876   : > { %v901_v17 = vpop.eup %900 }
 0x877   : > { %526 = vrot.lane.b32.xlu2 %v901_v17, %s928_s17 }
 0x8d1   : > { %v527_v19 = vpop.permute.xlu2 %526 }
 0x8d2   : > { %v529_v21 = vmul.f32 %v527_v19, %v512_v10 }
 0x8d4   : > { %531 = vrot.lane.b32.xlu0 %v529_v21, %s929_s18 }
 0x946   : > { %v1104_v23 = vpop.permute.xlu0 %531 }
 0x947   : > { %853 = vmatmul.msk.f32.vlgmr.msrb.gmra.mxu2 %vm347_vm4, %v1104_v23 }
 0x9ca   : > { %v552_v26 = vpop.f32.mrf.mxu2 }
 0x9cb   : > { %v555_v27 = vadd.f32 %v552_v26, %v325_v25 }
 0x9cd   : > { %902 = vtanh.f32 %v555_v27 }
 0x9d3   : > { %v903_v28 = vpop.eup %902 }
 0x9d4   : > { %v557_v29 = vmul.f32 %v903_v28, %v1049_v18 }
 0x9d6   : > { %v558_v30 = vadd.f32 %v557_v29, %v1051_v20 }
 0x9d8   : > { %561 = vrot.lane.b32.xlu1 %v558_v30, %s928_s17  ;;  %v559_v34 = vmul.f32 %v558_v30, %v523_v16 }
 0xa4a   : > { %v562_v31 = vpop.permute.xlu1 %561 }
 0xa4b   : > { %v564_v33 = vmul.f32 %v562_v31, %v558_v30  ;;  %v334_v31 = vadd.f32 %v1046_v12, %v1041_v9 }
 0xa4d   : > { %566 = vrot.lane.b32.xlu2 %v564_v33, %s929_s18 }
 0xaa7   : > { %v567_v35 = vpop.permute.xlu2 %566 }
 0xaa8   : > { %v569_v36 = vadd.f32 %v567_v35, %v559_v34 }
 0xaaa   : > { %904 = vtanh.f32 %v569_v36 }
 0xab0   : > { %v905_v37 = vpop.eup %904 }
 0xab1   : > { %572 = vrot.lane.b32.xlu0 %v905_v37, %s928_s17 }
 0xb23   : > { %v573_v38 = vpop.permute.xlu0 %572 }
 0xb24   : > { %v575_v39 = vmul.f32 %v573_v38, %v558_v30 }
 0xb26   : > { %577 = vrot.lane.b32.xlu1 %v575_v39, %s929_s18 }
 0xb98   : > { %v578_v45 = vpop.permute.xlu1 %577 }
 0xb99   : > { %854 = vmatmul.msk.f32.vlgmr.msrb.gmra.mxu3 %vm347_vm4, %v578_v45 }
 0xba1   : > { %861 = vmatmul.msk.f32.vlgmr.msra.gmra.mxu3 %vm347_vm4, %v578_v45 }
 0xc1c   : > { %v598_v48 = vpop.f32.mrf.mxu3 }
 0xc1d   : > { %v601_v50 = vadd.f32 %v598_v48, %v328_v47 }
 0xc1f   : > { %906 = vtanh.f32 %v601_v50 }
 0xc24   : > { %v756_v52 = vpop.f32.mrf.mxu3 }
 0xc25   : > { %v907_v53 = vpop.eup %906  ;;  %v757_v54 = vadd.f32 %v1132_v51, %v756_v52 }
 0xc26   : > { %v603_v55 = vmul.f32 %v907_v53, %v1049_v18 }
 0xc27   : > { %773 = vst.msk [vmem:[%s1139_s30 + $0x20] sm:$0xff] %vm768_vm5, %v757_v54 }
 0xc28   : > { %v604_v56 = vadd.f32 %v603_v55, %v1051_v20 }
 0xc2a   : > { %607 = vrot.lane.b32.xlu2 %v604_v56, %s928_s17  ;;  %v605_v59 = vmul.f32 %v604_v56, %v569_v36 }
 0xc84   : > { %v608_v57 = vpop.permute.xlu2 %607 }
 0xc85   : > { %v610_v58 = vmul.f32 %v608_v57, %v604_v56 }
 0xc87   : > { %612 = vrot.lane.b32.xlu0 %v610_v58, %s929_s18 }
 0xcf9   : > { %v613_v60 = vpop.permute.xlu0 %612 }
 0xcfa   : > { %v615_v61 = vadd.f32 %v613_v60, %v605_v59 }
 0xcfc   : > { %908 = vtanh.f32 %v615_v61 }
 0xd02   : > { %v909_v62 = vpop.eup %908 }
 0xd03   : > { %618 = vrot.lane.b32.xlu1 %v909_v62, %s928_s17 }
 0xd75   : > { %v619_v0 = vpop.permute.xlu1 %618 }
 0xd76   : > { %v621_v1 = vmul.f32 %v619_v0, %v604_v56 }
 0xd78   : > { %623 = vrot.lane.b32.xlu2 %v621_v1, %s929_s18 }
 0xdd2   : > { %v624_v3 = vpop.permute.xlu2 %623 }
 0xdd3   : > { %855 = vmatmul.msk.f32.vlgmr.msrb.gmra.mxu1 %vm347_vm4, %v624_v3  ;;  %862 = vmatmul.msk.f32.gmra.mxu3 %vm347_vm4, %v624_v3 }
 0xddb   : > { %857 = vmatmul.msk.f32.vlgmr.msra.gmra.mxu1 %vm347_vm4, %v1061_v32 }
 0xde3   : > { %858 = vmatmul.msk.f32.gmra.mxu1 %vm347_vm4, %v1078_v49 }
 0xdeb   : > { %859 = vmatmul.msk.f32.gmra.mxu1 %vm347_vm4, %v1091_v2 }
 0xdf3   : > { %860 = vmatmul.msk.f32.gmra.mxu1 %vm347_vm4, %v1104_v23 }
 0xe50   : > { %v644_v6 = vpop.f32.mrf.mxu1 }
 0xe51   : > { %v647_v7 = vadd.f32 %v644_v6, %v331_v5 }
 0xe53   : > { %910 = vtanh.f32 %v647_v7 }
 0xe56   : > { %v759_v8 = vpop.f32.mrf.mxu3 }
 0xe57   : > { %v760_v32 = vadd.f32 %v1132_v51, %v759_v8 }
 0xe58   : > { %v744_v10 = vpop.f32.mrf.mxu1 }
 0xe59   : > { %v911_v49 = vpop.eup %910  ;;  %774 = vst.msk [vmem:[%s1139_s30 + $0x28] sm:$0xff] %vm768_vm5, %v760_v32  ;;  %v745_v2 = vadd.f32 %v1132_v51, %v744_v10 }
 0xe5a   : > { %v649_v11 = vmul.f32 %v911_v49, %v1049_v18 }
 0xe5b   : > { %769 = vst.msk [vmem:[%s1139_s30] sm:$0xff] %vm768_vm5, %v745_v2 }
 0xe5c   : > { %v650_v13 = vadd.f32 %v649_v11, %v1051_v20 }
 0xe5e   : > { %653 = vrot.lane.b32.xlu0 %v650_v13, %s928_s17  ;;  %v651_v24 = vmul.f32 %v650_v13, %v615_v61 }
 0xe60   : > { %v747_v14 = vpop.f32.mrf.mxu1 }
 0xe61   : > { %v748_v15 = vadd.f32 %v1132_v51, %v747_v14 }
 0xe63   : > { %770 = vst.msk [vmem:[%s1139_s30 + $0x8] sm:$0xff] %vm768_vm5, %v748_v15 }
 0xe68   : > { %v750_v16 = vpop.f32.mrf.mxu1 }
 0xe69   : > { %v751_v17 = vadd.f32 %v1132_v51, %v750_v16 }
 0xe6b   : > { %771 = vst.msk [vmem:[%s1139_s30 + $0x10] sm:$0xff] %vm768_vm5, %v751_v17 }
 0xe70   : > { %v753_v19 = vpop.f32.mrf.mxu1 }
 0xe71   : > { %v754_v21 = vadd.f32 %v1132_v51, %v753_v19 }
 0xe73   : > { %772 = vst.msk [vmem:[%s1139_s30 + $0x18] sm:$0xff] %vm768_vm5, %v754_v21 }
 0xed0   : > { %v654_v22 = vpop.permute.xlu0 %653 }
 0xed1   : > { %v656_v23 = vmul.f32 %v654_v22, %v650_v13 }
 0xed3   : > { %658 = vrot.lane.b32.xlu1 %v656_v23, %s929_s18 }
 0xf45   : > { %v659_v25 = vpop.permute.xlu1 %658 }
 0xf46   : > { %v661_v26 = vadd.f32 %v659_v25, %v651_v24 }
 0xf48   : > { %912 = vtanh.f32 %v661_v26 }
 0xf4e   : > { %v913_v27 = vpop.eup %912 }
 0xf4f   : > { %664 = vrot.lane.b32.xlu2 %v913_v27, %s928_s17 }
 0xfa9   : > { %v665_v28 = vpop.permute.xlu2 %664 }
 0xfaa   : > { %v667_v29 = vmul.f32 %v665_v28, %v650_v13 }
 0xfac   : > { %669 = vrot.lane.b32.xlu0 %v667_v29, %s929_s18 }
0x101e   : > { %v670_v30 = vpop.permute.xlu0 %669 }
0x101f   : > { %856 = vmatmul.msk.f32.vlgmr.msra.gmra.mxu2 %vm347_vm4, %v670_v30  ;;  %863 = vmatmul.msk.f32.gmra.mxu3 %vm347_vm4, %v670_v30 }
0x10a2   : > { %v690_v33 = vpop.f32.mrf.mxu2  ;;  %v762_v34 = vpop.f32.mrf.mxu3 }
0x10a3   : > { %v693_v35 = vadd.f32 %v690_v33, %v334_v31  ;;  %v763_v36 = vadd.f32 %v1132_v51, %v762_v34 }
0x10a5   : > { %914 = vtanh.f32 %v693_v35  ;;  %775 = vst.msk [vmem:[%s1139_s30 + $0x30] sm:$0xff] %vm768_vm5, %v763_v36 }
0x10ab   : > { %v915_v37 = vpop.eup %914 }
0x10ac   : > { %v695_v38 = vmul.f32 %v915_v37, %v1049_v18 }
0x10ae   : > { %v696_v39 = vadd.f32 %v695_v38, %v1051_v20 }
0x10b0   : > { %699 = vrot.lane.b32.xlu1 %v696_v39, %s928_s17  ;;  %v697_v9 = vmul.f32 %v696_v39, %v661_v26 }
0x1122   : > { %v700_v40 = vpop.permute.xlu1 %699 }
0x1123   : > { %v702_v41 = vmul.f32 %v700_v40, %v696_v39 }
0x1125   : > { %704 = vrot.lane.b32.xlu2 %v702_v41, %s929_s18 }
0x117f   : > { %v705_v12 = vpop.permute.xlu2 %704 }
0x1180   : > { %v707_v42 = vadd.f32 %v705_v12, %v697_v9 }
0x1182   : > { %916 = vtanh.f32 %v707_v42 }
0x1188   : > { %v917_v43 = vpop.eup %916 }
0x1189   : > { %710 = vrot.lane.b32.xlu0 %v917_v43, %s928_s17 }
0x11fb   : > { %v711_v44 = vpop.permute.xlu0 %710 }
0x11fc   : > { %v713_v45 = vmul.f32 %v711_v44, %v696_v39 }
0x11fe   : > { %723 = vrot.lane.b32.xlu1 %v713_v45, %s929_s18 }
0x1270   : > { %v724_v18 = vpop.permute.xlu1 %723 }
0x1271   : > { %864 = vmatmul.msk.f32.gmra.mxu3 %vm347_vm4, %v724_v18 }
0x12f4   : > { %v765_v20 = vpop.f32.mrf.mxu3 }
0x12f5   : > { %v766_v46 = vadd.f32 %v1132_v51, %v765_v20 }
0x12f7   : > { %776 = vst.msk [vmem:[%s1139_s30 + $0x38] sm:$0xff] %vm768_vm5, %v766_v46 }
0x12f8 PF: > { %s18_s23 = sadd.s32 1, %s924_s23  }
0x12f9   : > { %p15_p4 = scmp.ge.s32.totalorder %s18_s23, 4  }
0x12fb   :  { %17 = sbr.rel (!%p15_p4) target bundleno = 3 (0x3), region = 74 }

</bundles_post_ra>
